<compile_context>
chip_gen: v7x
topology: tpu7x:2x2x1
jax: 0.10.0
libtpu: 0.0.40
codegen_flags: <defaults>
</compile_context>

<pallas_src>
import functools

import jax
import jax.numpy as jnp
from jax import lax
from jax.experimental import pallas as pl
from jax.experimental.pallas import tpu as pltpu


def graphcl_kernel(x_ref, adj_ref, pool_ref, we_ref, be_ref,
                   w1_ref, b1_ref, w2_ref, b2_ref, out_ref, acc_ref, *, agg_first):
    r = pl.program_id(1)                     # node-row tile index (reduction axis)

    @pl.when(r == 0)
    def _():
        acc_ref[...] = jnp.zeros_like(acc_ref)

    adj = adj_ref[...]                        # (G, TN, N_pad)    mxu dtype
    x = x_ref[...]                            # (G, N_pad, F_pad) mxu dtype
    we = we_ref[...]                          # (F_pad, E_pad)    mxu dtype
    g, tn, _ = adj.shape

    # ---- encoder (stand-in base_gnn): one dense GCN layer on this row tile ----
    # contraction order picked statically in the wrapper from F vs E.
    if agg_first:                                             # (adj_rows @ x) @ W
        agg = jnp.einsum('gtn,gnf->gtf', adj, x,
                         preferred_element_type=jnp.float32)
        hn = jnp.dot(agg.reshape(g * tn, -1).astype(we.dtype), we,
                     preferred_element_type=jnp.float32)
    else:                                                     # adj_rows @ (x @ W)
        xe = jnp.dot(x.reshape(g * x.shape[1], -1), we,
                     preferred_element_type=jnp.float32)
        xe = xe.reshape(g, x.shape[1], -1).astype(adj.dtype)
        hn = jnp.einsum('gtn,gne->gte', adj, xe,
                        preferred_element_type=jnp.float32).reshape(g * tn, -1)

    # bias + ReLU in f32 (v5e VPU has no bf16)
    hn = jnp.maximum(hn + be_ref[...], 0.0).reshape(g, tn, -1)    # (G, TN, E) f32

    # masked-mean pooling contribution of this row tile:
    # pool column = 1/N on real nodes, 0 on padded nodes (also kills the
    # ReLU(b_enc) garbage the zero-padded adjacency rows would contribute).
    acc_ref[...] += jnp.sum(hn * pool_ref[...][None, :, :], axis=1)   # (G, E_pad)

    @pl.when(r == pl.num_programs(1) - 1)
    def _():
        h = acc_ref[...]                                          # (G, E_pad) f32
        # (graph_pred_linear == Identity -> h feeds the projector directly)
        w1 = w1_ref[...]
        w2 = w2_ref[...]
        z1 = jnp.maximum(
            jnp.dot(h.astype(w1.dtype), w1,
                    preferred_element_type=jnp.float32) + b1_ref[...], 0.0)
        z = jnp.dot(z1.astype(w2.dtype), w2,
                    preferred_element_type=jnp.float32) + b2_ref[...]   # (G, P_pad)
        # F.normalize(z, dim=1): z / max(||z||, 1e-12) == z * rsqrt(max(sumsq, 1e-24))
        sumsq = jnp.sum(z * z, axis=1, keepdims=True)
        out_ref[...] = (z * lax.rsqrt(jnp.maximum(sumsq, 1e-24))).astype(out_ref.dtype)


def _round_up(v, m):
    return ((v + m - 1) // m) * m


def _pad2(a, rows, cols):
    return jnp.pad(a, ((0, rows - a.shape[0]), (0, cols - a.shape[1])))


def _vmem_budget_bytes():
    # Generation-aware cap: ~100 MiB on v5e/v6e (128 MiB physical VMEM),
    # 48 MiB on v7x (64 MiB per TensorCore).  Conservative fallback on failure.
    try:
        cap = getattr(pltpu.get_tpu_info(), "vmem_capacity_bytes", 64 << 20)
    except Exception:
        cap = 64 << 20
    return (100 << 20) if cap >= (128 << 20) else (48 << 20)


def graphcl_forward(x, adj, params, *, use_bf16=True):
    B, N, F = x.shape
    E = params["w_enc"].shape[1]
    P = params["w2"].shape[1]

    # lane-quantum padding: N is simultaneously adj's lane dim and the MXU K dim
    # of the dominant N^2 matmul, so it is 128-aligned like F/E/P.
    N_pad = _round_up(N, 128)
    F_pad = _round_up(F, 128)
    E_pad = _round_up(E, 128)
    P_pad = _round_up(P, 128)

    # bf16 halves HBM/VMEM traffic for adj/x/weights (adj is 0/1 so exact);
    # accumulation stays f32; biases stay f32 (v5e VPU has no bf16 VALU).
    mxu_dtype = jnp.bfloat16 if use_bf16 else jnp.float32
    itm = jnp.dtype(mxu_dtype).itemsize

    # ---- choose batch tile G (graphs / grid step) and node-row tile TN ----
    budget = _vmem_budget_bytes()
    weight_bytes = 2 * ((F_pad * E_pad + E_pad * E_pad + E_pad * P_pad) * itm
                        + (2 * E_pad + P_pad) * 4)            # 2x: default double-buffering
    headroom = 8 << 20
    avail = max(budget - headroom - weight_bytes, 4 << 20)

    x_bytes = N_pad * F_pad * itm                    # per-graph x block (resident over row tiles)
    adj_row = N_pad * itm                            # one adjacency row
    per_graph_full = 2 * (x_bytes + N_pad * adj_row)  # double-buffered, full adjacency

    if per_graph_full <= avail:
        tn = N_pad                                   # no row tiling needed
        g = max(1, int(avail // per_graph_full))
    else:
        # large-N: tile adjacency rows so VMEM stays bounded independent of N (v7x-safe)
        g = 1
        tn_bound = max((avail // 2 - x_bytes) // adj_row, 128)
        tn = max(128, int(tn_bound // 128) * 128)
        tn = min(tn, N_pad)
    g = int(min(g, B, 64))
    if B >= 16:                                      # keep enough graph steps for pipeline
        g = min(g, max(1, B // 8))                   # overlap / 2-TC sharding on v7x
    g = max(1, g)

    n_row_tiles = -(-N_pad // tn)
    N_pad = tn * n_row_tiles
    B_pad = -(-B // g) * g
    n_graph_steps = B_pad // g

    # cheaper contraction order for the N^2 matmul; row tiling forces agg-first
    # (x @ W would otherwise be recomputed every row tile).
    agg_first = (F_pad <= E_pad) or (n_row_tiles > 1)

    xp = jnp.pad(x, ((0, B_pad - B), (0, N_pad - N), (0, F_pad - F))).astype(mxu_dtype)
    adjp = jnp.pad(adj, ((0, B_pad - B), (0, N_pad - N), (0, N_pad - N))).astype(mxu_dtype)

    we = _pad2(params["w_enc"], F_pad, E_pad).astype(mxu_dtype)
    be = _pad2(params["b_enc"], 1, E_pad).astype(jnp.float32)
    w1 = _pad2(params["w1"], E_pad, E_pad).astype(mxu_dtype)
    b1 = _pad2(params["b1"], 1, E_pad).astype(jnp.float32)
    w2 = _pad2(params["w2"], E_pad, P_pad).astype(mxu_dtype)
    b2 = _pad2(params["b2"], 1, P_pad).astype(jnp.float32)

    # masked-mean pooling column: 1/N on real nodes, 0 on padded nodes
    pool = jnp.pad(jnp.full((N, 1), 1.0 / N, jnp.float32), ((0, N_pad - N), (0, 0)))

    block_bytes = (2 * g * (tn * N_pad + N_pad * F_pad) * itm      # adj + x blocks
                   + 2 * (g * P_pad + tn * 128) * 4)               # out + pool blocks
    vmem_limit = int(min(budget, max(16 << 20,
                                     block_bytes + weight_bytes + g * E_pad * 4 + headroom)))

    full = lambda shape: pl.BlockSpec(shape, lambda i, r: (0,) * len(shape))
    kernel = functools.partial(graphcl_kernel, agg_first=agg_first)

    out = pl.pallas_call(
        kernel,
        grid=(n_graph_steps, n_row_tiles),
        out_shape=jax.ShapeDtypeStruct((B_pad, P_pad), jnp.float32),
        in_specs=[
            pl.BlockSpec((g, N_pad, F_pad), lambda i, r: (i, 0, 0)),   # x (resident over r)
            pl.BlockSpec((g, tn, N_pad), lambda i, r: (i, r, 0)),      # adj row tile
            pl.BlockSpec((tn, 1), lambda i, r: (r, 0)),                # pooling column tile
            full((F_pad, E_pad)),    # w_enc  (grid-invariant)
            full((1, E_pad)),        # b_enc
            full((E_pad, E_pad)),    # w1
            full((1, E_pad)),        # b1
            full((E_pad, P_pad)),    # w2
            full((1, P_pad)),        # b2
        ],
        out_specs=pl.BlockSpec((g, P_pad), lambda i, r: (i, 0)),
        scratch_shapes=[pltpu.VMEM((g, E_pad), jnp.float32)],          # pooled-h accumulator
        compiler_params=pltpu.CompilerParams(
            dimension_semantics=("parallel", "arbitrary"),
            vmem_limit_bytes=vmem_limit,
        ),
    )(xp, adjp, pool, we, be, w1, b1, w2, b2)

    return out[:B, :P]


def graphcl_reference(x, adj, params):
    agg = jnp.einsum('bnm,bmf->bnf', adj, x)
    hn = jnp.maximum(jnp.einsum('bnf,fe->bne', agg, params["w_enc"]) + params["b_enc"], 0.0)
    h = jnp.mean(hn, axis=1)
    z1 = jnp.maximum(h @ params["w1"] + params["b1"], 0.0)
    z = z1 @ params["w2"] + params["b2"]
    norm = jnp.sqrt(jnp.sum(z * z, axis=1, keepdims=True))
    return z / jnp.maximum(norm, 1e-12)


if __name__ == "__main__":
    # Small shapes consistent with the module: B graphs, N nodes, F node-feature
    # dim, emb_dim E, proj_dim P (module default 512, scaled down).
    B, N, F, E, P = 2, 8, 16, 32, 128

    key = jax.random.PRNGKey(0)
    kx, ka, k0, k1, k2, k3, k4, k5 = jax.random.split(key, 8)

    x = jax.random.normal(kx, (B, N, F), dtype=jnp.float32)
    # symmetric adjacency with self loops
    a = (jax.random.uniform(ka, (B, N, N)) > 0.5).astype(jnp.float32)
    adj = jnp.clip(a + jnp.swapaxes(a, 1, 2) + jnp.eye(N)[None], 0.0, 1.0)

    params = {
        "w_enc": jax.random.normal(k0, (F, E), dtype=jnp.float32) * 0.1,
        "b_enc": jax.random.normal(k1, (1, E), dtype=jnp.float32) * 0.1,
        "w1":    jax.random.normal(k2, (E, E), dtype=jnp.float32) * 0.1,
        "b1":    jax.random.normal(k3, (1, E), dtype=jnp.float32) * 0.1,
        "w2":    jax.random.normal(k4, (E, P), dtype=jnp.float32) * 0.1,
        "b2":    jax.random.normal(k5, (1, P), dtype=jnp.float32) * 0.1,
    }

    ref = graphcl_reference(x, adj, params)

    # f32 path: tight check against the reference
    out_f32 = jax.block_until_ready(graphcl_forward(x, adj, params, use_bf16=False))
    assert out_f32.shape == (B, P)
    assert jnp.allclose(out_f32, ref, atol=2e-5, rtol=2e-5)
    assert jnp.allclose(jnp.linalg.norm(out_f32, axis=1), 1.0, atol=1e-4)

    # default bf16 MXU path (adj exact; x/weights rounded): looser tolerance
    out_bf16 = jax.block_until_ready(graphcl_forward(x, adj, params))
    assert out_bf16.shape == (B, P)
    assert jnp.allclose(out_bf16, ref, atol=3e-2, rtol=3e-2)
    assert jnp.allclose(jnp.linalg.norm(out_bf16, axis=1), 1.0, atol=1e-3)

    print("KERNEL_OK")
</pallas_src>

<mosaic_0001>
module attributes {stable_mosaic.version = 11 : i64} {
  func.func @graphcl_kernel(%arg0: i32, %arg1: i32, %arg2: memref<2x128x128xf32, #tpu.memory_space<vmem>>, %arg3: memref<2x128x128xf32, #tpu.memory_space<vmem>>, %arg4: memref<128x1xf32, #tpu.memory_space<vmem>>, %arg5: memref<128x128xf32, #tpu.memory_space<vmem>>, %arg6: memref<1x128xf32, #tpu.memory_space<vmem>>, %arg7: memref<128x128xf32, #tpu.memory_space<vmem>>, %arg8: memref<1x128xf32, #tpu.memory_space<vmem>>, %arg9: memref<128x128xf32, #tpu.memory_space<vmem>>, %arg10: memref<1x128xf32, #tpu.memory_space<vmem>>, %arg11: memref<2x128xf32, #tpu.memory_space<vmem>>, %arg12: memref<2x128xf32, #tpu.memory_space<vmem>>) attributes {dimension_semantics = [#tpu.dimension_semantics<parallel>, #tpu.dimension_semantics<arbitrary>], iteration_bounds = array<i64: 1, 1>, scalar_prefetch = 0 : i64, scratch_operands = 1 : i64, tpu.core_type = #tpu.core_type<tc>, window_params = [{transform_indices = @transform_0, window_bounds = array<i64: 2, 128, 128>}, {transform_indices = @transform_1, window_bounds = array<i64: 2, 128, 128>}, {transform_indices = @transform_2, window_bounds = array<i64: 128, 1>}, {pipeline_mode = #tpu.pipeline_mode<synchronous>, transform_indices = @transform_3, window_bounds = array<i64: 128, 128>}, {pipeline_mode = #tpu.pipeline_mode<synchronous>, transform_indices = @transform_4, window_bounds = array<i64: 1, 128>}, {pipeline_mode = #tpu.pipeline_mode<synchronous>, transform_indices = @transform_5, window_bounds = array<i64: 128, 128>}, {pipeline_mode = #tpu.pipeline_mode<synchronous>, transform_indices = @transform_6, window_bounds = array<i64: 1, 128>}, {pipeline_mode = #tpu.pipeline_mode<synchronous>, transform_indices = @transform_7, window_bounds = array<i64: 128, 128>}, {pipeline_mode = #tpu.pipeline_mode<synchronous>, transform_indices = @transform_8, window_bounds = array<i64: 1, 128>}, {transform_indices = @transform_9, window_bounds = array<i64: 2, 128>}]} {
    %c0_i32 = arith.constant 0 : i32
    %0 = arith.cmpi eq, %arg1, %c0_i32 : i32
    %1 = arith.extui %0 : i1 to i32
    %c0_i32_0 = arith.constant 0 : i32
    %2 = arith.cmpi ne, %1, %c0_i32_0 : i32
    scf.if %2 {
      %cst_21 = arith.constant 0.000000e+00 : f32
      %26 = vector.broadcast %cst_21 : f32 to vector<2x128xf32>
      %c0_22 = arith.constant 0 : index
      %c0_23 = arith.constant 0 : index
      %27 = vector.load %arg12[%c0_22, %c0_23] : memref<2x128xf32, #tpu.memory_space<vmem>>, vector<2x128xf32>
      tpu.vector_store %arg12[%c0_22, %c0_23], %26 {strides = array<i32>} : memref<2x128xf32, #tpu.memory_space<vmem>>, vector<2x128xf32>,
    } else {
    }
    %c0 = arith.constant 0 : index
    %c0_1 = arith.constant 0 : index
    %c0_2 = arith.constant 0 : index
    %3 = vector.load %arg3[%c0, %c0_1, %c0_2] : memref<2x128x128xf32, #tpu.memory_space<vmem>>, vector<2x128x128xf32>
    %c0_3 = arith.constant 0 : index
    %c0_4 = arith.constant 0 : index
    %c0_5 = arith.constant 0 : index
    %4 = vector.load %arg2[%c0_3, %c0_4, %c0_5] : memref<2x128x128xf32, #tpu.memory_space<vmem>>, vector<2x128x128xf32>
    %c0_6 = arith.constant 0 : index
    %c0_7 = arith.constant 0 : index
    %5 = vector.load %arg5[%c0_6, %c0_7] : memref<128x128xf32, #tpu.memory_space<vmem>>, vector<128x128xf32>
    "tpu.trace_start"() <{level = 10 : i32, message = "gtn,gnf->gtf"}> : () -> ()
    %cst = arith.constant dense<0.000000e+00> : vector<2x128x128xf32>
    %6 = tpu.matmul %3, %4, %cst {dimension_numbers = #tpu.dot_dimension_numbers<[2], [1], [1], [2], [0, 0, 0, 1, 1, 2], [0], [0]>} : vector<2x128x128xf32>, vector<2x128x128xf32>, vector<2x128x128xf32> -> vector<2x128x128xf32>
    "tpu.trace_stop"() : () -> ()
    %7 = vector.shape_cast %6 : vector<2x128x128xf32> to vector<256x128xf32>
    %cst_8 = arith.constant dense<0.000000e+00> : vector<256x128xf32>
    %8 = tpu.matmul %7, %5, %cst_8 {dimension_numbers = #tpu.dot_dimension_numbers<[1], [0], [0], [1], [0, 0, 1, 1], [], []>} : vector<256x128xf32>, vector<128x128xf32>, vector<256x128xf32> -> vector<256x128xf32>
    %c0_9 = arith.constant 0 : index
    %c0_10 = arith.constant 0 : index
    %9 = vector.load %arg6[%c0_9, %c0_10] : memref<1x128xf32, #tpu.memory_space<vmem>>, vector<1x128xf32>
    %10 = vector.broadcast %9 : vector<1x128xf32> to vector<256x128xf32>
    %11 = arith.addf %8, %10 : vector<256x128xf32>
    %cst_11 = arith.constant 0.000000e+00 : f32
    %12 = vector.broadcast %cst_11 : f32 to vector<256x128xf32>
    %13 = arith.maximumf %11, %12 : vector<256x128xf32>
    %14 = vector.shape_cast %13 : vector<256x128xf32> to vector<2x128x128xf32>
    %c0_12 = arith.constant 0 : index
    %c0_13 = arith.constant 0 : index
    %15 = vector.load %arg12[%c0_12, %c0_13] : memref<2x128xf32, #tpu.memory_space<vmem>>, vector<2x128xf32>
    %c0_14 = arith.constant 0 : index
    %c0_15 = arith.constant 0 : index
    %16 = vector.load %arg4[%c0_14, %c0_15] : memref<128x1xf32, #tpu.memory_space<vmem>>, vector<128x1xf32>
    %17 = vector.shape_cast %16 : vector<128x1xf32> to vector<1x128x1xf32>
    %18 = vector.broadcast %17 : vector<1x128x1xf32> to vector<2x128x128xf32>
    %19 = arith.mulf %14, %18 : vector<2x128x128xf32>
    %cst_16 = arith.constant dense<0.000000e+00> : vector<2x128xf32>
    %20 = vector.multi_reduction <add>, %19, %cst_16 [1] : vector<2x128x128xf32> to vector<2x128xf32>
    %21 = arith.addf %15, %20 : vector<2x128xf32>
    %c0_17 = arith.constant 0 : index
    %c0_18 = arith.constant 0 : index
    %22 = vector.load %arg12[%c0_17, %c0_18] : memref<2x128xf32, #tpu.memory_space<vmem>>, vector<2x128xf32>
    tpu.vector_store %arg12[%c0_17, %c0_18], %21 {strides = array<i32>} : memref<2x128xf32, #tpu.memory_space<vmem>>, vector<2x128xf32>,
    %c0_i32_19 = arith.constant 0 : i32
    %23 = arith.cmpi eq, %arg1, %c0_i32_19 : i32
    %24 = arith.extui %23 : i1 to i32
    %c0_i32_20 = arith.constant 0 : i32
    %25 = arith.cmpi ne, %24, %c0_i32_20 : i32
    scf.if %25 {
      %c0_21 = arith.constant 0 : index
      %c0_22 = arith.constant 0 : index
      %26 = vector.load %arg12[%c0_21, %c0_22] : memref<2x128xf32, #tpu.memory_space<vmem>>, vector<2x128xf32>
      %c0_23 = arith.constant 0 : index
      %c0_24 = arith.constant 0 : index
      %27 = vector.load %arg7[%c0_23, %c0_24] : memref<128x128xf32, #tpu.memory_space<vmem>>, vector<128x128xf32>
      %c0_25 = arith.constant 0 : index
      %c0_26 = arith.constant 0 : index
      %28 = vector.load %arg9[%c0_25, %c0_26] : memref<128x128xf32, #tpu.memory_space<vmem>>, vector<128x128xf32>
      %cst_27 = arith.constant dense<0.000000e+00> : vector<2x128xf32>
      %29 = tpu.matmul %26, %27, %cst_27 {dimension_numbers = #tpu.dot_dimension_numbers<[1], [0], [0], [1], [0, 0, 1, 1], [], []>} : vector<2x128xf32>, vector<128x128xf32>, vector<2x128xf32> -> vector<2x128xf32>
      %c0_28 = arith.constant 0 : index
      %c0_29 = arith.constant 0 : index
      %30 = vector.load %arg8[%c0_28, %c0_29] : memref<1x128xf32, #tpu.memory_space<vmem>>, vector<1x128xf32>
      %31 = vector.broadcast %30 : vector<1x128xf32> to vector<2x128xf32>
      %32 = arith.addf %29, %31 : vector<2x128xf32>
      %cst_30 = arith.constant 0.000000e+00 : f32
      %33 = vector.broadcast %cst_30 : f32 to vector<2x128xf32>
      %34 = arith.maximumf %32, %33 : vector<2x128xf32>
      %cst_31 = arith.constant dense<0.000000e+00> : vector<2x128xf32>
      %35 = tpu.matmul %34, %28, %cst_31 {dimension_numbers = #tpu.dot_dimension_numbers<[1], [0], [0], [1], [0, 0, 1, 1], [], []>} : vector<2x128xf32>, vector<128x128xf32>, vector<2x128xf32> -> vector<2x128xf32>
      %c0_32 = arith.constant 0 : index
      %c0_33 = arith.constant 0 : index
      %36 = vector.load %arg10[%c0_32, %c0_33] : memref<1x128xf32, #tpu.memory_space<vmem>>, vector<1x128xf32>
      %37 = vector.broadcast %36 : vector<1x128xf32> to vector<2x128xf32>
      %38 = arith.addf %35, %37 : vector<2x128xf32>
      %39 = arith.mulf %38, %38 : vector<2x128xf32>
      %cst_34 = arith.constant dense<0.000000e+00> : vector<2xf32>
      %40 = vector.multi_reduction <add>, %39, %cst_34 [1] : vector<2x128xf32> to vector<2xf32>
      %41 = vector.shape_cast %40 : vector<2xf32> to vector<2x1xf32>
      %cst_35 = arith.constant 1.000000e-24 : f32
      %42 = vector.broadcast %cst_35 : f32 to vector<2x1xf32>
      %43 = arith.maximumf %41, %42 : vector<2x1xf32>
      %44 = math.rsqrt %43 : vector<2x1xf32>
      %45 = vector.broadcast %44 : vector<2x1xf32> to vector<2x128xf32>
      %46 = arith.mulf %38, %45 : vector<2x128xf32>
      %c0_36 = arith.constant 0 : index
      %c0_37 = arith.constant 0 : index
      %47 = vector.load %arg11[%c0_36, %c0_37] : memref<2x128xf32, #tpu.memory_space<vmem>>, vector<2x128xf32>
      tpu.vector_store %arg11[%c0_36, %c0_37], %46 {strides = array<i32>} : memref<2x128xf32, #tpu.memory_space<vmem>>, vector<2x128xf32>,
    } else {
    }
    return
  }
  func.func @transform_0(%arg0: i32, %arg1: i32) -> (i32, i32, i32) {
    %c0_i32 = arith.constant 0 : i32
    %c0_i32_0 = arith.constant 0 : i32
    %c0_i32_1 = arith.constant 0 : i32
    return %arg0, %c0_i32, %c0_i32_0 : i32, i32, i32
  }
  func.func @transform_1(%arg0: i32, %arg1: i32) -> (i32, i32, i32) {
    %c0_i32 = arith.constant 0 : i32
    %c0_i32_0 = arith.constant 0 : i32
    return %arg0, %arg1, %c0_i32 : i32, i32, i32
  }
  func.func @transform_2(%arg0: i32, %arg1: i32) -> (i32, i32) {
    %c0_i32 = arith.constant 0 : i32
    %c0_i32_0 = arith.constant 0 : i32
    return %arg1, %c0_i32 : i32, i32
  }
  func.func @transform_3(%arg0: i32, %arg1: i32) -> (i32, i32) {
    %c0_i32 = arith.constant 0 : i32
    %c0_i32_0 = arith.constant 0 : i32
    %c0_i32_1 = arith.constant 0 : i32
    return %c0_i32, %c0_i32_0 : i32, i32
  }
  func.func @transform_4(%arg0: i32, %arg1: i32) -> (i32, i32) {
    %c0_i32 = arith.constant 0 : i32
    %c0_i32_0 = arith.constant 0 : i32
    %c0_i32_1 = arith.constant 0 : i32
    return %c0_i32, %c0_i32_0 : i32, i32
  }
  func.func @transform_5(%arg0: i32, %arg1: i32) -> (i32, i32) {
    %c0_i32 = arith.constant 0 : i32
    %c0_i32_0 = arith.constant 0 : i32
    %c0_i32_1 = arith.constant 0 : i32
    return %c0_i32, %c0_i32_0 : i32, i32
  }
  func.func @transform_6(%arg0: i32, %arg1: i32) -> (i32, i32) {
    %c0_i32 = arith.constant 0 : i32
    %c0_i32_0 = arith.constant 0 : i32
    %c0_i32_1 = arith.constant 0 : i32
    return %c0_i32, %c0_i32_0 : i32, i32
  }
  func.func @transform_7(%arg0: i32, %arg1: i32) -> (i32, i32) {
    %c0_i32 = arith.constant 0 : i32
    %c0_i32_0 = arith.constant 0 : i32
    %c0_i32_1 = arith.constant 0 : i32
    return %c0_i32, %c0_i32_0 : i32, i32
  }
  func.func @transform_8(%arg0: i32, %arg1: i32) -> (i32, i32) {
    %c0_i32 = arith.constant 0 : i32
    %c0_i32_0 = arith.constant 0 : i32
    %c0_i32_1 = arith.constant 0 : i32
    return %c0_i32, %c0_i32_0 : i32, i32
  }
  func.func @transform_9(%arg0: i32, %arg1: i32) -> (i32, i32) {
    %c0_i32 = arith.constant 0 : i32
    %c0_i32_0 = arith.constant 0 : i32
    return %arg0, %c0_i32 : i32, i32
  }
}

</mosaic_0001>

<bundles_post_ra>
// kernel: tpu_custom_call.1
= control target key start
LH: loop header
LB: loop body
LE: loop exit
PB: predicated region body
PF: predicated region fallthrough
CT: control target
= control target key end

     0   :  { %14 = vsyncpa [#allocation4], 0  ;;  %s2185_s0 = inlined_call_operand.hbm [shape: f32[2,128,128], index: 0, kind: input, shape index: {}]   ;;  %s2186_s1 = inlined_call_operand.hbm [shape: f32[2,128,128], index: 1, kind: input, shape index: {}]   ;;  %s2187_s2 = inlined_call_operand.vmem [shape: f32[128,1], index: 2, kind: input, shape index: {}]   ;;  %s2188_s3 = inlined_call_operand.vmem [shape: f32[128,128], index: 3, kind: input, shape index: {}]   ;;  %s2189_s4 = inlined_call_operand.vmem [shape: f32[1,128], index: 4, kind: input, shape index: {}]   ;;  %s2190_s5 = inlined_call_operand.hbm [shape: f32[128,128], index: 5, kind: input, shape index: {}]   ;;  %s2191_s6 = inlined_call_operand.vmem [shape: f32[1,128], index: 6, kind: input, shape index: {}]   ;;  %s2192_s7 = inlined_call_operand.hbm [shape: f32[128,128], index: 7, kind: input, shape index: {}]   ;;  %s2193_s8 = inlined_call_operand.vmem [shape: f32[1,128], index: 8, kind: input, shape index: {}]   ;;  %s2194_s9 = inlined_call_operand.hbm [shape: f32[2,128], index: 9, kind: output, shape index: {}]  }
   0x1   :  { %15 = vsyncpa [#allocation7], 0 }
   0x2   :  { %16 = vsyncpa [#allocation10], 0 }
   0x3   :  { %17 = vsyncpa [#allocation5], 0  ;;  %s1810_s30 = smov [#allocation6]   ;;  %s1811_s11 = smov [#allocation3]  }
   0x4   :  { %s35_s10 = sshll.u32 %s1810_s30, 4  ;;  %s23_s12 = sshll.u32 %s1811_s11, 4  ;;  %s36_s10 = int_to_ptr.vmem [resolvable:$true] %s35_s10  ;;  %s1871_s12 = int_to_ptr.vmem [resolvable:$true] %s23_s12 }
   0x5   :  { %s1692_s15 = scalar_lea.hbm %s2186_s1, 4096 }
   0x6   :  { %p1693_p0 = scmp.ne.s32.totalorder %s2186_s1, %s1692_s15  ;;  %p1696_p1 = scmp.lt.u32.totalorder %s1692_s15, %s2186_s1 }
   0x8   :  { %p1698_p2 = pnand %p1696_p1, %p1693_p0 }
   0xa   :  { %1701 = shalt.err (!%p1698_p2)
}
   0xb   :  { %s1702_s20 = scalar_lea.vmem %s36_s10, 4096  ;;  %p1707_p4 = scmp.lt.s32.totalorder %s36_s10, %s36_s10 }
   0xc   :  { %p1703_p3 = scmp.ne.s32.totalorder %s36_s10, %s1702_s20  ;;  %p1708_p5 = scmp.lt.s32.totalorder %s1702_s20, %s1702_s20 }
   0xe   :  { %p1709_p6 = por %p1708_p5, %p1707_p4 }
  0x10   :  { %p1710_p7 = pnand %p1709_p6, %p1703_p3 }
  0x12   :  { %1713 = shalt.err (!%p1710_p7)
}
  0x13   :  { %s1812_s21 = smov 128   ;;  %s1813_s22 = smov 8  }
  0x14   :  { %41 = dma.hbm_to_vmem [thread:$0]  %s2186_s1, 4096, %s36_s10, [#allocation7], %s1812_s21, %s1812_s21, %s1813_s22  }
  0x15   :  { %s1714_s27 = scalar_lea.hbm %s2185_s0, 4096 }
  0x16   :  { %p1715_p8 = scmp.ne.s32.totalorder %s2185_s0, %s1714_s27  ;;  %p1718_p9 = scmp.lt.u32.totalorder %s1714_s27, %s2185_s0 }
  0x18   :  { %p1720_p10 = pnand %p1718_p9, %p1715_p8 }
  0x1a   :  { %1723 = shalt.err (!%p1720_p10)
}
  0x1b   :  { %s1724_s13 = scalar_lea.vmem %s1871_s12, 4096  ;;  %p1729_p12 = scmp.lt.s32.totalorder %s1871_s12, %s1871_s12 }
  0x1c   :  { %p1725_p11 = scmp.ne.s32.totalorder %s1871_s12, %s1724_s13  ;;  %p1730_p13 = scmp.lt.s32.totalorder %s1724_s13, %s1724_s13 }
  0x1e   :  { %p1731_p0 = por %p1730_p13, %p1729_p12 }
  0x20   :  { %p1732_p1 = pnand %p1731_p0, %p1725_p11 }
  0x22   :  { %1735 = shalt.err (!%p1732_p1)
}
  0x23   :  { %29 = dma.hbm_to_vmem [thread:$0]  %s2185_s0, 4096, %s1871_s12, [#allocation4], %s1812_s21, %s1812_s21, %s1813_s22  }
  0x24   :  { %s1814_s14 = smov [#allocation8]   ;;  %s1815_s16 = smov [#allocation9]  }
  0x25   :  { %s53_s15 = sshll.u32 %s1814_s14, 4  ;;  %s67_s17 = sshll.u32 %s1815_s16, 4  ;;  %s54_s15 = int_to_ptr.vmem [resolvable:$true] %s53_s15  ;;  %s1908_s17 = int_to_ptr.vmem [resolvable:$true] %s67_s17 }
  0x26   :  { %s1736_s20 = scalar_lea.hbm %s2190_s5, 2048 }
  0x27   :  { %p1737_p2 = scmp.ne.s32.totalorder %s2190_s5, %s1736_s20  ;;  %p1740_p3 = scmp.lt.u32.totalorder %s1736_s20, %s2190_s5 }
  0x29   :  { %p1742_p4 = pnand %p1740_p3, %p1737_p2 }
  0x2b   :  { %1745 = shalt.err (!%p1742_p4)
}
  0x2c   :  { %s1746_s0 = scalar_lea.vmem %s54_s15, 2048  ;;  %p1751_p6 = scmp.lt.s32.totalorder %s54_s15, %s54_s15 }
  0x2d   :  { %p1747_p5 = scmp.ne.s32.totalorder %s54_s15, %s1746_s0  ;;  %p1752_p7 = scmp.lt.s32.totalorder %s1746_s0, %s1746_s0 }
  0x2f   :  { %p1753_p8 = por %p1752_p7, %p1751_p6 }
  0x31   :  { %p1754_p9 = pnand %p1753_p8, %p1747_p5 }
  0x33   :  { %1757 = shalt.err (!%p1754_p9)
}
  0x34   :  { %59 = dma.hbm_to_vmem [thread:$0]  %s2190_s5, 2048, %s54_s15, [#allocation7], %s1812_s21, %s1812_s21, %s1813_s22  }
  0x35   :  { %s1758_s30 = scalar_lea.hbm %s2192_s7, 2048 }
  0x36   :  { %p1759_p10 = scmp.ne.s32.totalorder %s2192_s7, %s1758_s30  ;;  %p1762_p11 = scmp.lt.u32.totalorder %s1758_s30, %s2192_s7 }
  0x38   :  { %p1764_p12 = pnand %p1762_p11, %p1759_p10 }
  0x3a   :  { %1767 = shalt.err (!%p1764_p12)
}
  0x3b   :  { %s1768_s14 = scalar_lea.vmem %s1908_s17, 2048  ;;  %p1773_p0 = scmp.lt.s32.totalorder %s1908_s17, %s1908_s17 }
  0x3c   :  { %p1769_p13 = scmp.ne.s32.totalorder %s1908_s17, %s1768_s14  ;;  %p1774_p1 = scmp.lt.s32.totalorder %s1768_s14, %s1768_s14 }
  0x3e   :  { %p1775_p2 = por %p1774_p1, %p1773_p0 }
  0x40   :  { %p1776_p3 = pnand %p1775_p2, %p1769_p13 }
  0x42   :  { %1779 = shalt.err (!%p1776_p3)
}
  0x43   :  { %73 = dma.hbm_to_vmem [thread:$0]  %s2192_s7, 2048, %s1908_s17, [#allocation10], %s1812_s21, %s1812_s21, %s1813_s22  }
  0x44   :  { %1802 = dma.done.wait [#allocation4], 4096  }
  0x45   :  { %1803 = vsyncadd [#allocation4], 4294963200 }
  0x46   :  { %1804 = dma.done.wait [#allocation7], 6144  }
  0x47   :  { %1805 = vsyncadd [#allocation7], 4294961152 }
  0x48   :  { %1806 = dma.done.wait [#allocation10], 2048  }
  0x49   :  { %1807 = vsyncadd [#allocation10], 4294965248  ;;  %v125_v0 = vld [vmem:[#allocation3] sm:$0xff]  ;;  %v126_v1 = vld [vmem:[#allocation3 + $0x8] sm:$0xff]  ;;  %vm1819_vm0 = vmmov 0   ;;  %vm900_vm1 = vcmask 1041409  }
  0x4a   :  { %v127_v2 = vld [vmem:[#allocation3 + $0x10] sm:$0xff]  ;;  %v1533_v3 = vpack.c.bf16 %v126_v1, %v125_v0  ;;  %v128_v4 = vld [vmem:[#allocation3 + $0x18] sm:$0xff]  ;;  %v129_v6 = vld [vmem:[#allocation3 + $0x20] sm:$0xff]  ;;  %vm1097_vm2 = vcmask 1041408  }
  0x4b   :  { %v1537_v5 = vpack.c.bf16 %v128_v4, %v127_v2  ;;  %v130_v7 = vld [vmem:[#allocation3 + $0x28] sm:$0xff]  ;;  %v93_v9 = vld [vmem:[#allocation6] sm:$0xff]  ;;  %v131_v11 = vld [vmem:[#allocation3 + $0x30] sm:$0xff] }
  0x4c   :  { %1534 = vmatprep.subr.bf16.mxu0 %v1533_v3  ;;  %v1541_v8 = vpack.c.bf16 %v130_v7, %v129_v6  ;;  %v141_v10 = vld [vmem:[#allocation3 + $0x80] sm:$0xff]  ;;  %v132_v12 = vld [vmem:[#allocation3 + $0x38] sm:$0xff]  ;;  %1303 = vmatprep.mubr.f32.mxu0 %v93_v9  ;;  %v142_v13 = vld [vmem:[#allocation3 + $0x88] sm:$0xff] }
  0x4d   :  { %1536 = vmatpush3.bf16.msra.mxu0 %v1533_v3  ;;  %v1565_v14 = vpack.c.bf16 %v142_v13, %v141_v10  ;;  %v143_v15 = vld [vmem:[#allocation3 + $0x90] sm:$0xff]  ;;  %v144_v16 = vld [vmem:[#allocation3 + $0x98] sm:$0xff]  ;;  %v145_v18 = vld [vmem:[#allocation3 + $0xa0] sm:$0xff]  ;;  %v1545_v20 = vpack.c.bf16 %v132_v12, %v131_v11 }
  0x4e   :  { %1538 = vmatprep.subr.bf16.mxu0 %v1537_v5  ;;  %v1569_v17 = vpack.c.bf16 %v144_v16, %v143_v15  ;;  %v146_v19 = vld [vmem:[#allocation3 + $0xa8] sm:$0xff]  ;;  %v133_v21 = vld [vmem:[#allocation3 + $0x40] sm:$0xff]  ;;  %v147_v24 = vld [vmem:[#allocation3 + $0xb0] sm:$0xff] }
  0x4f   :  { %1566 = vmatprep.subr.bf16.mxu1 %v1565_v14  ;;  %v134_v22 = vld [vmem:[#allocation3 + $0x48] sm:$0xff]  ;;  %v1573_v23 = vpack.c.bf16 %v146_v19, %v145_v18  ;;  %v148_v25 = vld [vmem:[#allocation3 + $0xb8] sm:$0xff]  ;;  %v135_v27 = vld [vmem:[#allocation3 + $0x50] sm:$0xff] }
  0x50   :  { %1568 = vmatpush3.bf16.msra.mxu1 %v1565_v14  ;;  %v1549_v26 = vpack.c.bf16 %v134_v22, %v133_v21  ;;  %v136_v28 = vld [vmem:[#allocation3 + $0x58] sm:$0xff]  ;;  %v1577_v29 = vpack.c.bf16 %v148_v25, %v147_v24  ;;  %v149_v30 = vld [vmem:[#allocation3 + $0xc0] sm:$0xff]  ;;  %v150_v31 = vld [vmem:[#allocation3 + $0xc8] sm:$0xff] }
  0x51   :  { %1540 = vmatpush3.bf16.msra.mxu0 %v1537_v5  ;;  %1570 = vmatprep.subr.bf16.mxu1 %v1569_v17  ;;  %v109_v32 = vld [vmem:[#allocation6 + $0x80] sm:$0xff]  ;;  %v1553_v33 = vpack.c.bf16 %v136_v28, %v135_v27  ;;  %v138_v35 = vld [vmem:[#allocation3 + $0x68] sm:$0xff]  ;;  %v1581_v36 = vpack.c.bf16 %v150_v31, %v149_v30  ;;  %v151_v37 = vld [vmem:[#allocation3 + $0xd0] sm:$0xff] }
  0x52   :  { %1542 = vmatprep.subr.bf16.mxu0 %v1541_v8  ;;  %1359 = vmatprep.mubr.f32.mxu1 %v109_v32  ;;  %v137_v34 = vld [vmem:[#allocation3 + $0x60] sm:$0xff]  ;;  %v152_v38 = vld [vmem:[#allocation3 + $0xd8] sm:$0xff]  ;;  %v139_v40 = vld [vmem:[#allocation3 + $0x70] sm:$0xff] }
  0x53   :  { %v1557_v39 = vpack.c.bf16 %v138_v35, %v137_v34  ;;  %v140_v41 = vld [vmem:[#allocation3 + $0x78] sm:$0xff]  ;;  %v1585_v42 = vpack.c.bf16 %v152_v38, %v151_v37  ;;  %v153_v43 = vld [vmem:[#allocation3 + $0xe0] sm:$0xff]  ;;  %v154_v44 = vld [vmem:[#allocation3 + $0xe8] sm:$0xff] }
  0x54   :  { %1572 = vmatpush3.bf16.msra.mxu1 %v1569_v17  ;;  %v1561_v45 = vpack.c.bf16 %v140_v41, %v139_v40  ;;  %v157_v46 = vld [vmem:[%s2188_s3] sm:$0xff]  ;;  %v158_v47 = vld [vmem:[%s2188_s3 + $0x8] sm:$0xff]  ;;  %v1589_v48 = vpack.c.bf16 %v154_v44, %v153_v43  ;;  %v155_v49 = vld [vmem:[#allocation3 + $0xf0] sm:$0xff] }
  0x55   :  { %1544 = vmatpush3.bf16.msra.mxu0 %v1541_v8  ;;  %1574 = vmatprep.subr.bf16.mxu1 %v1573_v23  ;;  %v156_v50 = vld [vmem:[#allocation3 + $0xf8] sm:$0xff]  ;;  %v1597_v51 = vpack.c.bf16 %v158_v47, %v157_v46  ;;  %v159_v52 = vld [vmem:[%s2188_s3 + $0x10] sm:$0xff]  ;;  %v162_v59 = vld [vmem:[%s2188_s3 + $0x28] sm:$0xff] }
  0x56   :  { %1546 = vmatprep.subr.bf16.mxu0 %v1545_v20  ;;  %v160_v53 = vld [vmem:[%s2188_s3 + $0x18] sm:$0xff]  ;;  %v1593_v54 = vpack.c.bf16 %v156_v50, %v155_v49  ;;  %v94_v55 = vld [vmem:[#allocation6 + $0x8] sm:$0xff]  ;;  %v161_v58 = vld [vmem:[%s2188_s3 + $0x20] sm:$0xff] }
  0x57   :  { %v95_v56 = vld [vmem:[#allocation6 + $0x10] sm:$0xff]  ;;  %v1601_v57 = vpack.c.bf16 %v160_v53, %v159_v52  ;;  %v96_v60 = vld [vmem:[#allocation6 + $0x18] sm:$0xff]  ;;  %v97_v61 = vld [vmem:[#allocation6 + $0x20] sm:$0xff]  ;;  %v1605_v62 = vpack.c.bf16 %v162_v59, %v161_v58 }
  0x58   :  { %1576 = vmatpush3.bf16.msra.mxu1 %v1573_v23  ;;  %v110_v63 = vld [vmem:[#allocation6 + $0x88] sm:$0xff]  ;;  %v164_v1 = vld [vmem:[%s2188_s3 + $0x38] sm:$0xff]  ;;  %v165_v7 = vld [vmem:[%s2188_s3 + $0x40] sm:$0xff] }
  0x59   :  { %1548 = vmatpush3.bf16.msra.mxu0 %v1545_v20  ;;  %1578 = vmatprep.subr.bf16.mxu1 %v1577_v29  ;;  %v163_v0 = vld [vmem:[%s2188_s3 + $0x30] sm:$0xff]  ;;  %v112_v6 = vld [vmem:[#allocation6 + $0x98] sm:$0xff]  ;;  %v166_v8 = vld [vmem:[%s2188_s3 + $0x48] sm:$0xff] }
  0x5a   :  { %1550 = vmatprep.subr.bf16.mxu0 %v1549_v26  ;;  %v111_v2 = vld [vmem:[#allocation6 + $0x90] sm:$0xff]  ;;  %v98_v3 = vld [vmem:[#allocation6 + $0x28] sm:$0xff]  ;;  %v1609_v5 = vpack.c.bf16 %v164_v1, %v163_v0  ;;  %v113_v9 = vld [vmem:[#allocation6 + $0xa0] sm:$0xff]  ;;  %v1613_v12 = vpack.c.bf16 %v166_v8, %v165_v7 }
  0x5b   :  { %v99_v4 = vld [vmem:[#allocation6 + $0x30] sm:$0xff]  ;;  %v100_v10 = vld [vmem:[#allocation6 + $0x38] sm:$0xff]  ;;  %v101_v11 = vld [vmem:[#allocation6 + $0x40] sm:$0xff] }
  0x5c   :  { %1580 = vmatpush3.bf16.msra.mxu1 %v1577_v29  ;;  %v114_v13 = vld [vmem:[#allocation6 + $0xa8] sm:$0xff]  ;;  %v168_v15 = vld [vmem:[%s2188_s3 + $0x58] sm:$0xff]  ;;  %v169_v21 = vld [vmem:[%s2188_s3 + $0x60] sm:$0xff] }
  0x5d   :  { %1552 = vmatpush3.bf16.msra.mxu0 %v1549_v26  ;;  %1582 = vmatprep.subr.bf16.mxu1 %v1581_v36  ;;  %v167_v14 = vld [vmem:[%s2188_s3 + $0x50] sm:$0xff]  ;;  %v116_v20 = vld [vmem:[#allocation6 + $0xb8] sm:$0xff]  ;;  %v170_v22 = vld [vmem:[%s2188_s3 + $0x68] sm:$0xff] }
  0x5e   :  { %1554 = vmatprep.subr.bf16.mxu0 %v1553_v33  ;;  %v115_v16 = vld [vmem:[#allocation6 + $0xb0] sm:$0xff]  ;;  %v102_v17 = vld [vmem:[#allocation6 + $0x48] sm:$0xff]  ;;  %v1617_v19 = vpack.c.bf16 %v168_v15, %v167_v14  ;;  %v117_v23 = vld [vmem:[#allocation6 + $0xc0] sm:$0xff]  ;;  %v1621_v26 = vpack.c.bf16 %v170_v22, %v169_v21 }
  0x5f   :  { %v103_v18 = vld [vmem:[#allocation6 + $0x50] sm:$0xff]  ;;  %v104_v24 = vld [vmem:[#allocation6 + $0x58] sm:$0xff]  ;;  %v105_v25 = vld [vmem:[#allocation6 + $0x60] sm:$0xff] }
  0x60   :  { %1584 = vmatpush3.bf16.msra.mxu1 %v1581_v36  ;;  %v118_v27 = vld [vmem:[#allocation6 + $0xc8] sm:$0xff]  ;;  %v172_v29 = vld [vmem:[%s2188_s3 + $0x78] sm:$0xff]  ;;  %v121_v35 = vld [vmem:[#allocation6 + $0xe0] sm:$0xff] }
  0x61   :  { %1556 = vmatpush3.bf16.msra.mxu0 %v1553_v33  ;;  %1586 = vmatprep.subr.bf16.mxu1 %v1585_v42  ;;  %v171_v28 = vld [vmem:[%s2188_s3 + $0x70] sm:$0xff]  ;;  %v120_v34 = vld [vmem:[#allocation6 + $0xd8] sm:$0xff]  ;;  %v729_v43 = vld [vmem:[%s2187_s2 + $0x8] sm:$0xff] }
  0x62   :  { %1558 = vmatprep.subr.bf16.mxu0 %v1557_v39  ;;  %v119_v30 = vld [vmem:[#allocation6 + $0xd0] sm:$0xff]  ;;  %v106_v31 = vld [vmem:[#allocation6 + $0x68] sm:$0xff]  ;;  %v1625_v33 = vpack.c.bf16 %v172_v29, %v171_v28  ;;  %v108_v36 = vld [vmem:[#allocation6 + $0x78] sm:$0xff]  ;;  %v1817_v28 = vmov 0.0|0.0  }
  0x63   :  { %v107_v32 = vld [vmem:[#allocation6 + $0x70] sm:$0xff]  ;;  %v122_v37 = vld [vmem:[#allocation6 + $0xe8] sm:$0xff]  ;;  %v728_v40 = vld [vmem:[%s2187_s2] sm:$0xff] }
  0x64   :  { %1588 = vmatpush3.bf16.msra.mxu1 %v1585_v42  ;;  %v123_v38 = vld [vmem:[#allocation6 + $0xf0] sm:$0xff]  ;;  %v1816_v42 = vmov 0   ;;  %v732_v46 = vld [vmem:[%s2187_s2 + $0x20] sm:$0xff]  ;;  %v737_v49 = vld [vmem:[%s2187_s2 + $0x48] sm:$0xff] }
  0x65   :  { %1560 = vmatpush3.bf16.msra.mxu0 %v1557_v39  ;;  %1590 = vmatprep.subr.bf16.mxu1 %v1589_v48  ;;  %v124_v39 = vld [vmem:[#allocation6 + $0xf8] sm:$0xff]  ;;  %v730_v41 = vld [vmem:[%s2187_s2 + $0x10] sm:$0xff]  ;;  %v741_v53 = vld [vmem:[%s2187_s2 + $0x68] sm:$0xff] }
  0x66   :  { %1562 = vmatprep.subr.bf16.mxu0 %v1561_v45  ;;  %1688 = vset.pattern.permute.xlu0 %v1816_v42  ;;  %v731_v44 = vld [vmem:[%s2187_s2 + $0x18] sm:$0xff]  ;;  %v736_v50 = vld [vmem:[%s2187_s2 + $0x40] sm:$0xff]  ;;  %v738_v52 = vld [vmem:[%s2187_s2 + $0x50] sm:$0xff] }
  0x67   :  { %1689 = vset.pattern.permute.xlu1 %v1816_v42  ;;  %746 = vperm.xlu0 %1688, %v728_v40   ;;  %v735_v47 = vld [vmem:[%s2187_s2 + $0x38] sm:$0xff]  ;;  %v1818_v40 = vmov 0.0  }
  0x68   :  { %1592 = vmatpush3.bf16.msra.mxu1 %v1589_v48  ;;  %756 = vperm.xlu1 %1689, %v730_v41   ;;  %v734_v48 = vld [vmem:[%s2187_s2 + $0x30] sm:$0xff]  ;;  %92 = vst [vmem:[#allocation2] sm:$0x3] %v1818_v40 }
  0x69   :  { %1564 = vmatpush3.bf16.msra.mxu0 %v1561_v45  ;;  %1594 = vmatprep.subr.bf16.mxu1 %v1593_v54  ;;  %v733_v45 = vld [vmem:[%s2187_s2 + $0x28] sm:$0xff]  ;;  %v911_v29 = vld [vmem:[#allocation8 + $0x10] sm:$0xff] }
  0x6a   :  { %1598 = vmatprep.subr.bf16.mxu0 %v1597_v51  ;;  %v919_v42 = vld [vmem:[#allocation8 + $0x50] sm:$0xff] }
  0x6b   :  { %751 = vperm.xlu0 %1688, %v729_v43   ;;  %v920_v43 = vld [vmem:[#allocation8 + $0x58] sm:$0xff] }
  0x6c   :  { %1304 = vmatmul.mubr.f32.vlgmr.msra.gmra.mrb[0].mxu0 %v94_v55  ;;  %1596 = vmatpush3.bf16.msra.mxu1 %v1593_v54  ;;  %v740_v54 = vld [vmem:[%s2187_s2 + $0x60] sm:$0xff]  ;;  %v743_v55 = vld [vmem:[%s2187_s2 + $0x78] sm:$0xff] }
  0x6d   :  { %1306 = vmatprep.mubr.f32.mxu0 %v95_v56  ;;  %1600 = vmatpush3.bf16.msra.mxu0 %v1597_v51  ;;  %v739_v51 = vld [vmem:[%s2187_s2 + $0x58] sm:$0xff]  ;;  %v742_v56 = vld [vmem:[%s2187_s2 + $0x70] sm:$0xff] }
  0x6e   :  { %1602 = vmatprep.subr.bf16.mxu0 %v1601_v57  ;;  %761 = vperm.xlu1 %1689, %v731_v44   ;;  %v1645_v44 = vpack.c.bf16 %v920_v43, %v919_v42 }
  0x6f   :  { %1360 = vmatmul.mubr.f32.vlgmr.msra.gmra.mrb[0].mxu1 %v110_v63  ;;  %766 = vperm.xlu0 %1688, %v732_v46   ;;  %v922_v46 = vld [vmem:[#allocation8 + $0x68] sm:$0xff] }
  0x70   :  { %1307 = vmatmul.mubr.f32.gmra.mrb[2].mxu0 %v96_v60  ;;  %1362 = vmatprep.mubr.f32.mxu1 %v111_v2 }
  0x71   :  { %1309 = vmatprep.mubr.f32.mxu0 %v97_v61  ;;  %1604 = vmatpush3.bf16.msra.mxu0 %v1601_v57 }
  0x72   :  { %1606 = vmatprep.subr.bf16.mxu0 %v1605_v62  ;;  %771 = vperm.xlu1 %1689, %v733_v45   ;;  %v921_v45 = vld [vmem:[#allocation8 + $0x60] sm:$0xff] }
  0x73   :  { %1363 = vmatmul.mubr.f32.gmra.mrb[2].mxu1 %v112_v6  ;;  %776 = vperm.xlu0 %1688, %v734_v48   ;;  %v923_v48 = vld [vmem:[#allocation8 + $0x70] sm:$0xff] }
  0x74   :  { %1310 = vmatmul.mubr.f32.gmra.mrb[4].mxu0 %v98_v3  ;;  %1365 = vmatprep.mubr.f32.mxu1 %v113_v9 }
  0x75   :  { %1312 = vmatprep.mubr.f32.mxu0 %v99_v4  ;;  %1608 = vmatpush3.bf16.msra.mxu0 %v1605_v62 }
  0x76   :  { %1610 = vmatprep.subr.bf16.mxu0 %v1609_v5  ;;  %781 = vperm.xlu1 %1689, %v735_v47   ;;  %v1648_v47 = vpack.c.bf16 %v922_v46, %v921_v45 }
  0x77   :  { %1366 = vmatmul.mubr.f32.gmra.mrb[4].mxu1 %v114_v13  ;;  %786 = vperm.xlu0 %1688, %v736_v50  }
  0x78   :  { %1313 = vmatmul.mubr.f32.gmra.mrb[6].mxu0 %v100_v10  ;;  %1368 = vmatprep.mubr.f32.mxu1 %v115_v16 }
  0x79   :  { %1315 = vmatprep.mubr.f32.mxu0 %v101_v11  ;;  %1612 = vmatpush3.bf16.msra.mxu0 %v1609_v5 }
  0x7a   :  { %1614 = vmatprep.subr.bf16.mxu0 %v1613_v12  ;;  %791 = vperm.xlu1 %1689, %v737_v49   ;;  %v924_v49 = vld [vmem:[#allocation8 + $0x78] sm:$0xff] }
  0x7b   :  { %1369 = vmatmul.mubr.f32.gmra.mrb[6].mxu1 %v116_v20  ;;  %796 = vperm.xlu0 %1688, %v738_v52   ;;  %v1651_v50 = vpack.c.bf16 %v924_v49, %v923_v48 }
  0x7c   :  { %1316 = vmatmul.mubr.f32.gmra.mrb[8].mxu0 %v102_v17  ;;  %1371 = vmatprep.mubr.f32.mxu1 %v117_v23 }
  0x7d   :  { %1318 = vmatprep.mubr.f32.mxu0 %v103_v18  ;;  %1616 = vmatpush3.bf16.msra.mxu0 %v1613_v12 }
  0x7e   :  { %1618 = vmatprep.subr.bf16.mxu0 %v1617_v19  ;;  %801 = vperm.xlu1 %1689, %v739_v51  }
  0x7f   :  { %1372 = vmatmul.mubr.f32.gmra.mrb[8].mxu1 %v118_v27  ;;  %806 = vperm.xlu0 %1688, %v740_v54  }
  0x80   :  { %1319 = vmatmul.mubr.f32.gmra.mrb[10].mxu0 %v104_v24  ;;  %1374 = vmatprep.mubr.f32.mxu1 %v119_v30  ;;  %v912_v30 = vld [vmem:[#allocation8 + $0x18] sm:$0xff] }
  0x81   :  { %1321 = vmatprep.mubr.f32.mxu0 %v105_v25  ;;  %1620 = vmatpush3.bf16.msra.mxu0 %v1617_v19  ;;  %v909_v25 = vld [vmem:[#allocation8] sm:$0xff] }
  0x82   :  { %1622 = vmatprep.subr.bf16.mxu0 %v1621_v26  ;;  %811 = vperm.xlu1 %1689, %v741_v53  }
  0x83   :  { %1375 = vmatmul.mubr.f32.gmra.mrb[10].mxu1 %v120_v34  ;;  %816 = vperm.xlu0 %1688, %v742_v56  }
  0x84   :  { %1322 = vmatmul.mubr.f32.gmra.mrb[12].mxu0 %v106_v31  ;;  %1377 = vmatprep.mubr.f32.mxu1 %v121_v35  ;;  %v1633_v31 = vpack.c.bf16 %v912_v30, %v911_v29  ;;  %v915_v35 = vld [vmem:[#allocation8 + $0x30] sm:$0xff] }
  0x85   :  { %1324 = vmatprep.mubr.f32.mxu0 %v107_v32  ;;  %1624 = vmatpush3.bf16.msra.mxu0 %v1621_v26  ;;  %v910_v26 = vld [vmem:[#allocation8 + $0x8] sm:$0xff]  ;;  %v913_v32 = vld [vmem:[#allocation8 + $0x20] sm:$0xff] }
  0x86   :  { %1626 = vmatprep.subr.bf16.mxu0 %v1625_v33  ;;  %821 = vperm.xlu1 %1689, %v743_v55   ;;  %v1630_v27 = vpack.c.bf16 %v910_v26, %v909_v25  ;;  %v2064_v55 = vld [vmem:[%s2189_s4] ss:$0 sm:$0xff] }
  0x87   :  { %1378 = vmatmul.mubr.f32.gmra.mrb[12].mxu1 %v122_v37  ;;  %1629 = vmatprep.subr.bf16.mxu1 %v1817_v28 }
  0x88   :  { %1325 = vmatmul.mubr.f32.gmra.mrb[14].mxu0 %v108_v36  ;;  %1380 = vmatprep.mubr.f32.mxu1 %v123_v38  ;;  %v916_v36 = vld [vmem:[#allocation8 + $0x38] sm:$0xff]  ;;  %v917_v38 = vld [vmem:[#allocation8 + $0x40] sm:$0xff] }
  0x89   :  { %1628 = vmatpush3.bf16.msra.mxu0 %v1625_v33  ;;  %1631 = vmatpush3.bf16.msra.mxu1 %v1630_v27  ;;  %v914_v33 = vld [vmem:[#allocation8 + $0x28] sm:$0xff]  ;;  %v1639_v37 = vpack.c.bf16 %v916_v36, %v915_v35 }
  0x8a   :  { %1632 = vmatprep.subr.bf16.mxu1 %v1817_v28  ;;  %v1636_v34 = vpack.c.bf16 %v914_v33, %v913_v32 }
  0x8b   :  { %1381 = vmatmul.mubr.f32.gmra.mrb[14].mxu1 %v124_v39  ;;  %v918_v39 = vld [vmem:[#allocation8 + $0x48] sm:$0xff] }
  0x8c   :  { %v1642_v41 = vpack.c.bf16 %v918_v39, %v917_v38  ;;  %1495 = vmatprep.mubr.msk.f32.mxu1 %vm1819_vm0, %v1818_v40 }
  0x8d   :  { %1634 = vmatpush3.bf16.msra.mxu1 %v1633_v31 }
  0x8e   :  { %1635 = vmatprep.subr.bf16.mxu1 %v1817_v28 }
  0x91   :  { %1637 = vmatpush3.bf16.msra.mxu1 %v1636_v34 }
  0x92   :  { %1638 = vmatprep.subr.bf16.mxu1 %v1817_v28 }
  0x95   :  { %1640 = vmatpush3.bf16.msra.mxu1 %v1639_v37 }
  0x96   :  { %1641 = vmatprep.subr.bf16.mxu1 %v1817_v28 }
  0x99   :  { %1643 = vmatpush3.bf16.msra.mxu1 %v1642_v41 }
  0x9a   :  { %1644 = vmatprep.subr.bf16.mxu1 %v1817_v28 }
  0x9d   :  { %1646 = vmatpush3.bf16.msra.mxu1 %v1645_v44 }
  0x9e   :  { %1647 = vmatprep.subr.bf16.mxu1 %v1817_v28 }
  0xa1   :  { %1649 = vmatpush3.bf16.msra.mxu1 %v1648_v47 }
  0xa2   :  { %1650 = vmatprep.subr.bf16.mxu1 %v1817_v28 }
  0xa5   :  { %1652 = vmatpush3.bf16.msra.mxu1 %v1651_v50 }
  0xa6   :  { %1653 = vmatprep.subr.bf16.mxu1 %v1817_v28 }
  0xe6   :  { %v2053_v51 = vpop.permute.xlu0 %746 }
  0xe7   :  { %v2055_v52 = vpop.permute.xlu1 %756 }
  0xea   :  { %v2057_v53 = vpop.permute.xlu0 %751 }
  0xed   :  { %v2059_v54 = vpop.permute.xlu1 %761 }
 0x13f   :  { %v1305_v57 = vpop.f32.mrb[0].mxu0 }
 0x140   :  { %v239_v58 = vpop.f32.mrb[1].mxu0 }
 0x141   :  { %1415 = vmatprep.mubr.f32.mxu0 %v239_v58 }
 0x142   :  { %1416 = vmatmul.mubr.f32.vlgmr.msra.gmra.mrb[16].mxu0 %v1305_v57  ;;  %v1361_v61 = vpop.f32.mrb[0].mxu1 }
 0x143   :  { %v1308_v59 = vpop.f32.mrb[2].mxu0  ;;  %v384_v62 = vpop.f32.mrb[1].mxu1 }
 0x144   :  { %v249_v60 = vpop.f32.mrb[3].mxu0 }
 0x145   :  { %1418 = vmatprep.mubr.f32.mxu0 %v249_v60 }
 0x146   :  { %1419 = vmatmul.mubr.f32.gmra.mrb[18].mxu0 %v1308_v59  ;;  %v1364_v1 = vpop.f32.mrb[2].mxu1  ;;  %v2067_v59 = vpop.permute.xlu0 %766 }
 0x147   :  { %v1311_v63 = vpop.f32.mrb[4].mxu0  ;;  %v394_v2 = vpop.f32.mrb[3].mxu1 }
 0x148   :  { %v259_v0 = vpop.f32.mrb[5].mxu0 }
 0x149   :  { %1421 = vmatprep.mubr.f32.mxu0 %v259_v0 }
 0x14a   :  { %1422 = vmatmul.mubr.f32.gmra.mrb[20].mxu0 %v1311_v63  ;;  %v1367_v5 = vpop.f32.mrb[4].mxu1 }
 0x14b   :  { %v1314_v3 = vpop.f32.mrb[6].mxu0  ;;  %v404_v6 = vpop.f32.mrb[5].mxu1 }
 0x14c   :  { %v269_v4 = vpop.f32.mrb[7].mxu0 }
 0x14d   :  { %1424 = vmatprep.mubr.f32.mxu0 %v269_v4 }
 0x14e   :  { %1425 = vmatmul.mubr.f32.gmra.mrb[22].mxu0 %v1314_v3  ;;  %v1370_v9 = vpop.f32.mrb[6].mxu1 }
 0x14f   :  { %v1317_v7 = vpop.f32.mrb[8].mxu0  ;;  %v414_v10 = vpop.f32.mrb[7].mxu1 }
 0x150   :  { %v279_v8 = vpop.f32.mrb[9].mxu0 }
 0x151   :  { %1427 = vmatprep.mubr.f32.mxu0 %v279_v8 }
 0x152   :  { %1428 = vmatmul.mubr.f32.gmra.mrb[24].mxu0 %v1317_v7  ;;  %v1373_v13 = vpop.f32.mrb[8].mxu1 }
 0x153   :  { %v1320_v11 = vpop.f32.mrb[10].mxu0  ;;  %v424_v14 = vpop.f32.mrb[9].mxu1 }
 0x154   :  { %v289_v12 = vpop.f32.mrb[11].mxu0 }
 0x155   :  { %1430 = vmatprep.mubr.f32.mxu0 %v289_v12 }
 0x156   :  { %1431 = vmatmul.mubr.f32.gmra.mrb[26].mxu0 %v1320_v11  ;;  %v1376_v17 = vpop.f32.mrb[10].mxu1 }
 0x157   :  { %v1323_v15 = vpop.f32.mrb[12].mxu0  ;;  %v434_v18 = vpop.f32.mrb[11].mxu1 }
 0x158   :  { %v299_v16 = vpop.f32.mrb[13].mxu0 }
 0x159   :  { %1433 = vmatprep.mubr.f32.mxu0 %v299_v16 }
 0x15a   :  { %1434 = vmatmul.mubr.f32.gmra.mrb[28].mxu0 %v1323_v15  ;;  %v1379_v21 = vpop.f32.mrb[12].mxu1 }
 0x15b   :  { %v1326_v19 = vpop.f32.mrb[14].mxu0  ;;  %v444_v22 = vpop.f32.mrb[13].mxu1 }
 0x15c   :  { %v309_v20 = vpop.f32.mrb[15].mxu0 }
 0x15d   :  { %1436 = vmatprep.mubr.f32.mxu0 %v309_v20 }
 0x15e   :  { %1437 = vmatmul.mubr.f32.gmra.mrb[30].mxu0 %v1326_v19  ;;  %v1382_v23 = vpop.f32.mrb[14].mxu1 }
 0x15f   :  { %1439 = vmatprep.mubr.f32.mxu0 %v384_v62  ;;  %v454_v24 = vpop.f32.mrb[15].mxu1  ;;  %v2070_v62 = vpop.permute.xlu1 %771 }
 0x162   :  { %1440 = vmatmul.mubr.f32.gmra.mrb[32].mxu0 %v1361_v61 }
 0x163   :  { %1442 = vmatprep.mubr.f32.mxu0 %v394_v2 }
 0x166   :  { %1443 = vmatmul.mubr.f32.gmra.mrb[34].mxu0 %v1364_v1 }
 0x167   :  { %1445 = vmatprep.mubr.f32.mxu0 %v404_v6  ;;  %v2076_v6 = vpop.permute.xlu0 %776 }
 0x16a   :  { %1446 = vmatmul.mubr.f32.gmra.mrb[36].mxu0 %v1367_v5 }
 0x16b   :  { %1448 = vmatprep.mubr.f32.mxu0 %v414_v10 }
 0x16e   :  { %1449 = vmatmul.mubr.f32.gmra.mrb[38].mxu0 %v1370_v9 }
 0x16f   :  { %1451 = vmatprep.mubr.f32.mxu0 %v424_v14 }
 0x172   :  { %1452 = vmatmul.mubr.f32.gmra.mrb[40].mxu0 %v1373_v13  ;;  %v2079_v13 = vpop.permute.xlu1 %781 }
 0x173   :  { %1454 = vmatprep.mubr.f32.mxu0 %v434_v18 }
 0x176   :  { %1455 = vmatmul.mubr.f32.gmra.mrb[42].mxu0 %v1376_v17  ;;  %v2089_v27 = vpop.permute.xlu1 %791 }
 0x177   :  { %1457 = vmatprep.mubr.f32.mxu0 %v444_v22 }
 0x17a   :  { %1458 = vmatmul.mubr.f32.gmra.mrb[44].mxu0 %v1379_v21  ;;  %v2099_v48 = vpop.permute.xlu1 %801 }
 0x17b   :  { %1460 = vmatprep.mubr.f32.mxu0 %v454_v24 }
 0x17e   :  { %1461 = vmatmul.mubr.f32.gmra.mrb[46].mxu0 %v1382_v23  ;;  %v2085_v23 = vpop.permute.xlu0 %786 }
 0x182   :  { %v2095_v39 = vpop.permute.xlu0 %796 }
 0x215   :  { %v1417_v56 = vpop.f32.mrb[16].mxu0 }
 0x216   :  { %v542_v57 = vadd.f32 %v1417_v56, %v2064_v55  ;;  %v536_v58 = vpop.f32.mrb[17].mxu0 }
 0x217   :  { %v537_v60 = vadd.f32 %v2064_v55, %v536_v58 }
 0x218   :  { %v696_v61 = vmax.f32 %v542_v57, 0.0 }
 0x219   :  { %v695_v63 = vmax.f32 %v537_v60, 0.0  ;;  %v1420_v0 = vpop.f32.mrb[18].mxu0 }
 0x21a   :  { %v825_v1 = vmul.f32 %v2057_v53, %v696_v61  ;;  %v552_v2 = vadd.f32 %v1420_v0, %v2064_v55  ;;  %v546_v3 = vpop.f32.mrb[19].mxu0 }
 0x21b   :  { %v824_v4 = vmul.f32 %v2053_v51, %v695_v63  ;;  %v547_v5 = vadd.f32 %v2064_v55, %v546_v3 }
 0x21c   :  { %v698_v8 = vmax.f32 %v552_v2, 0.0  ;;  %v2105_v2 = vpop.permute.xlu0 %806 }
 0x21d   :  { %v856_v7 = vadd.f32 %v825_v1, %v824_v4  ;;  %v697_v9 = vmax.f32 %v547_v5, 0.0  ;;  %v1423_v10 = vpop.f32.mrb[20].mxu0 }
 0x21e   :  { %v562_v11 = vadd.f32 %v1423_v10, %v2064_v55  ;;  %v556_v12 = vpop.f32.mrb[21].mxu0  ;;  %v827_v17 = vmul.f32 %v2059_v54, %v698_v8 }
 0x21f   :  { %v826_v14 = vmul.f32 %v2055_v52, %v697_v9  ;;  %v557_v15 = vadd.f32 %v2064_v55, %v556_v12 }
 0x220   :  { %v700_v18 = vmax.f32 %v562_v11, 0.0 }
 0x221   :  { %v857_v16 = vadd.f32 %v856_v7, %v826_v14  ;;  %v699_v19 = vmax.f32 %v557_v15, 0.0  ;;  %v1426_v20 = vpop.f32.mrb[22].mxu0  ;;  %v2109_v7 = vpop.permute.xlu1 %811 }
 0x222   :  { %v572_v21 = vadd.f32 %v1426_v20, %v2064_v55  ;;  %v566_v22 = vpop.f32.mrb[23].mxu0  ;;  %v829_v29 = vmul.f32 %v2070_v62, %v700_v18 }
 0x223   :  { %v858_v24 = vadd.f32 %v857_v16, %v827_v17  ;;  %v828_v25 = vmul.f32 %v2067_v59, %v699_v19  ;;  %v567_v26 = vadd.f32 %v2064_v55, %v566_v22  ;;  %v2115_v19 = vpop.permute.xlu0 %816 }
 0x224   :  { %v702_v30 = vmax.f32 %v572_v21, 0.0 }
 0x225   :  { %v859_v31 = vadd.f32 %v858_v24, %v828_v25  ;;  %v701_v32 = vmax.f32 %v567_v26, 0.0  ;;  %v1429_v33 = vpop.f32.mrb[24].mxu0  ;;  %v2118_v26 = vpop.permute.xlu1 %821 }
 0x226   :  { %v582_v34 = vadd.f32 %v1429_v33, %v2064_v55  ;;  %v576_v35 = vpop.f32.mrb[25].mxu0  ;;  %v831_v41 = vmul.f32 %v2079_v13, %v702_v30 }
 0x227   :  { %v830_v36 = vmul.f32 %v2076_v6, %v701_v32  ;;  %v860_v37 = vadd.f32 %v859_v31, %v829_v29  ;;  %v577_v38 = vadd.f32 %v2064_v55, %v576_v35 }
 0x228   :  { %v704_v42 = vmax.f32 %v582_v34, 0.0 }
 0x229   :  { %v861_v43 = vadd.f32 %v860_v37, %v830_v36  ;;  %v703_v44 = vmax.f32 %v577_v38, 0.0  ;;  %v1432_v45 = vpop.f32.mrb[26].mxu0 }
 0x22a   :  { %v592_v46 = vadd.f32 %v1432_v45, %v2064_v55  ;;  %v586_v47 = vpop.f32.mrb[27].mxu0  ;;  %v833_v57 = vmul.f32 %v2089_v27, %v704_v42 }
 0x22b   :  { %v832_v49 = vmul.f32 %v2085_v23, %v703_v44  ;;  %v862_v50 = vadd.f32 %v861_v43, %v831_v41  ;;  %v587_v56 = vadd.f32 %v2064_v55, %v586_v47 }
 0x22c   :  { %v706_v58 = vmax.f32 %v592_v46, 0.0 }
 0x22d   :  { %v863_v60 = vadd.f32 %v862_v50, %v832_v49  ;;  %v705_v61 = vmax.f32 %v587_v56, 0.0  ;;  %v1435_v63 = vpop.f32.mrb[28].mxu0 }
 0x22e   :  { %v602_v0 = vadd.f32 %v1435_v63, %v2064_v55  ;;  %v596_v1 = vpop.f32.mrb[29].mxu0  ;;  %v835_v8 = vmul.f32 %v2099_v48, %v706_v58 }
 0x22f   :  { %v834_v3 = vmul.f32 %v2095_v39, %v705_v61  ;;  %v864_v4 = vadd.f32 %v863_v60, %v833_v57  ;;  %v597_v5 = vadd.f32 %v2064_v55, %v596_v1 }
 0x230   :  { %v708_v9 = vmax.f32 %v602_v0, 0.0 }
 0x231   :  { %v865_v10 = vadd.f32 %v864_v4, %v834_v3  ;;  %v707_v11 = vmax.f32 %v597_v5, 0.0  ;;  %v1438_v12 = vpop.f32.mrb[30].mxu0 }
 0x232   :  { %v612_v14 = vadd.f32 %v1438_v12, %v2064_v55  ;;  %v606_v15 = vpop.f32.mrb[31].mxu0  ;;  %v837_v20 = vmul.f32 %v2109_v7, %v708_v9 }
 0x233   :  { %v836_v16 = vmul.f32 %v2105_v2, %v707_v11  ;;  %v866_v17 = vadd.f32 %v865_v10, %v835_v8  ;;  %v607_v18 = vadd.f32 %v2064_v55, %v606_v15 }
 0x234   :  { %v710_v21 = vmax.f32 %v612_v14, 0.0 }
 0x235   :  { %v867_v22 = vadd.f32 %v866_v17, %v836_v16  ;;  %v709_v24 = vmax.f32 %v607_v18, 0.0  ;;  %v1441_v25 = vpop.f32.mrb[32].mxu0 }
 0x236   :  { %v622_v29 = vadd.f32 %v1441_v25, %v2064_v55  ;;  %v616_v30 = vpop.f32.mrb[33].mxu0  ;;  %v839_v35 = vmul.f32 %v2118_v26, %v710_v21 }
 0x237   :  { %v838_v31 = vmul.f32 %v2115_v19, %v709_v24  ;;  %v868_v32 = vadd.f32 %v867_v22, %v837_v20  ;;  %v617_v33 = vadd.f32 %v2064_v55, %v616_v30 }
 0x238   :  { %v712_v34 = vmax.f32 %v622_v29, 0.0 }
 0x239   :  { %v869_v36 = vadd.f32 %v868_v32, %v838_v31  ;;  %v711_v37 = vmax.f32 %v617_v33, 0.0  ;;  %v1444_v38 = vpop.f32.mrb[34].mxu0 }
 0x23a   :  { %v841_v41 = vmul.f32 %v2057_v53, %v712_v34  ;;  %v632_v42 = vadd.f32 %v1444_v38, %v2064_v55  ;;  %v626_v43 = vpop.f32.mrb[35].mxu0 }
 0x23b   :  { %v2126_v44 = vadd.f32 %v869_v36, %v839_v35  ;;  %v840_v45 = vmul.f32 %v2053_v51, %v711_v37  ;;  %v627_v46 = vadd.f32 %v2064_v55, %v626_v43 }
 0x23c   :  { %v714_v49 = vmax.f32 %v632_v42, 0.0 }
 0x23d   :  { %v877_v47 = vadd.f32 %v841_v41, %v840_v45  ;;  %v713_v50 = vmax.f32 %v627_v46, 0.0  ;;  %v1447_v56 = vpop.f32.mrb[36].mxu0 }
 0x23e   :  { %v642_v57 = vadd.f32 %v1447_v56, %v2064_v55  ;;  %v636_v58 = vpop.f32.mrb[37].mxu0  ;;  %v843_v61 = vmul.f32 %v2059_v54, %v714_v49  ;;  %v871_v49 = vrot.slane %v2126_v44, 4 }
 0x23f   :  { %v842_v60 = vmul.f32 %v2055_v52, %v713_v50  ;;  %v637_v53 = vadd.f32 %v2064_v55, %v636_v58 }
 0x240   :  { %v716_v0 = vmax.f32 %v642_v57, 0.0 }
 0x241   :  { %v878_v63 = vadd.f32 %v877_v47, %v842_v60  ;;  %v715_v1 = vmax.f32 %v637_v53, 0.0  ;;  %v1450_v3 = vpop.f32.mrb[38].mxu0 }
 0x242   :  { %v652_v51 = vadd.f32 %v1450_v3, %v2064_v55  ;;  %v646_v4 = vpop.f32.mrb[39].mxu0  ;;  %v845_v10 = vmul.f32 %v2070_v62, %v716_v0 }
 0x243   :  { %v844_v5 = vmul.f32 %v2067_v59, %v715_v1  ;;  %v879_v8 = vadd.f32 %v878_v63, %v843_v61  ;;  %v647_v9 = vadd.f32 %v2064_v55, %v646_v4 }
 0x244   :  { %v718_v52 = vmax.f32 %v652_v51, 0.0 }
 0x245   :  { %v880_v11 = vadd.f32 %v879_v8, %v844_v5  ;;  %v717_v12 = vmax.f32 %v647_v9, 0.0  ;;  %v1453_v14 = vpop.f32.mrb[40].mxu0 }
 0x246   :  { %v662_v54 = vadd.f32 %v1453_v14, %v2064_v55  ;;  %v656_v15 = vpop.f32.mrb[41].mxu0  ;;  %v847_v20 = vmul.f32 %v2079_v13, %v718_v52  ;;  %v727_v52 = vld [vmem:[#allocation2] sm:$0x3]  ;;  %v926_v14 = vld [vmem:[#allocation9 + $0x8] sm:$0xff] }
 0x247   :  { %v846_v16 = vmul.f32 %v2076_v6, %v717_v12  ;;  %v881_v17 = vadd.f32 %v880_v11, %v845_v10  ;;  %v657_v18 = vadd.f32 %v2064_v55, %v656_v15  ;;  %v928_v15 = vld [vmem:[#allocation9 + $0x18] sm:$0xff] }
 0x248   :  { %v720_v21 = vmax.f32 %v662_v54, 0.0  ;;  %v927_v54 = vld [vmem:[#allocation9 + $0x10] sm:$0xff] }
 0x249   :  { %v882_v59 = vadd.f32 %v881_v17, %v846_v16  ;;  %v719_v22 = vmax.f32 %v657_v18, 0.0  ;;  %v1456_v24 = vpop.f32.mrb[42].mxu0  ;;  %v1657_v17 = vpack.c.bf16 %v928_v15, %v927_v54  ;;  %v929_v18 = vld [vmem:[#allocation9 + $0x20] sm:$0xff] }
 0x24a   :  { %v672_v62 = vadd.f32 %v1456_v24, %v2064_v55  ;;  %v666_v25 = vpop.f32.mrb[43].mxu0  ;;  %v849_v32 = vmul.f32 %v2089_v27, %v720_v21  ;;  %v931_v21 = vld [vmem:[#allocation9 + $0x30] sm:$0xff] }
 0x24b   :  { %v848_v29 = vmul.f32 %v2085_v23, %v719_v22  ;;  %v883_v30 = vadd.f32 %v882_v59, %v847_v20  ;;  %v667_v31 = vadd.f32 %v2064_v55, %v666_v25  ;;  %v930_v20 = vld [vmem:[#allocation9 + $0x28] sm:$0xff]  ;;  %v932_v22 = vld [vmem:[#allocation9 + $0x38] sm:$0xff] }
 0x24c   :  { %v722_v33 = vmax.f32 %v672_v62, 0.0  ;;  %v1660_v59 = vpack.c.bf16 %v930_v20, %v929_v18  ;;  %v1663_v24 = vpack.c.bf16 %v932_v22, %v931_v21  ;;  %v933_v62 = vld [vmem:[#allocation9 + $0x40] sm:$0xff]  ;;  %v934_v25 = vld [vmem:[#allocation9 + $0x48] sm:$0xff] }
 0x24d   :  { %v884_v6 = vadd.f32 %v883_v30, %v848_v29  ;;  %v721_v34 = vmax.f32 %v667_v31, 0.0  ;;  %v1459_v35 = vpop.f32.mrb[44].mxu0  ;;  %v1666_v29 = vpack.c.bf16 %v934_v25, %v933_v62  ;;  %v936_v30 = vld [vmem:[#allocation9 + $0x58] sm:$0xff] }
 0x24e   :  { %v682_v13 = vadd.f32 %v1459_v35, %v2064_v55  ;;  %v676_v36 = vpop.f32.mrb[45].mxu0  ;;  %v851_v42 = vmul.f32 %v2099_v48, %v722_v33  ;;  %v872_v48 = vadd.f32 %v871_v49, %v2126_v44  ;;  %v940_v35 = vld [vmem:[#allocation9 + $0x78] sm:$0xff] }
 0x24f   :  { %v850_v37 = vmul.f32 %v2095_v39, %v721_v34  ;;  %v885_v38 = vadd.f32 %v884_v6, %v849_v32  ;;  %v677_v41 = vadd.f32 %v2064_v55, %v676_v36  ;;  %v937_v32 = vld [vmem:[#allocation9 + $0x60] sm:$0xff]  ;;  %v938_v6 = vld [vmem:[#allocation9 + $0x68] sm:$0xff]  ;;  %v939_v34 = vld [vmem:[#allocation9 + $0x70] sm:$0xff] }
 0x250   :  { %v724_v43 = vmax.f32 %v682_v13, 0.0  ;;  %v873_v3 = vrot.slane %v872_v48, 2  ;;  %v1672_v33 = vpack.c.bf16 %v938_v6, %v937_v32  ;;  %v1675_v13 = vpack.c.bf16 %v940_v35, %v939_v34  ;;  %v1123_v36 = vld [vmem:[%s2191_s6] ss:$0 sm:$0xff]  ;;  %s1820_s6 = smov [#allocation11]  }
 0x251   :  { %v886_v23 = vadd.f32 %v885_v38, %v850_v37  ;;  %v723_v45 = vmax.f32 %v677_v41, 0.0  ;;  %v1462_v46 = vpop.f32.mrb[46].mxu0  ;;  %s1111_s29 = sshll.u32 %s1820_s6, 4  ;;  %s1112_s29 = int_to_ptr.vmem [resolvable:$true] %s1111_s29 }
 0x252   :  { %v692_v27 = vadd.f32 %v1462_v46, %v2064_v55  ;;  %v686_v47 = vpop.f32.mrb[47].mxu0  ;;  %v853_v39 = vmul.f32 %v2109_v7, %v724_v43  ;;  %s1780_s30 = scalar_lea.vmem %s1112_s29, 32  ;;  %p1785_p5 = scmp.lt.s32.totalorder %s1112_s29, %s1112_s29 }
 0x253   :  { %v852_v50 = vmul.f32 %v2105_v2, %v723_v45  ;;  %v887_v56 = vadd.f32 %v886_v23, %v851_v42  ;;  %v687_v57 = vadd.f32 %v2064_v55, %v686_v47  ;;  %v874_v2 = vadd.f32 %v873_v3, %v872_v48  ;;  %v1124_v23 = vld [vmem:[%s2193_s8] ss:$0 sm:$0xff]  ;;  %p1781_p4 = scmp.ne.s32.totalorder %s1112_s29, %s1780_s30  ;;  %p1786_p6 = scmp.lt.s32.totalorder %s1780_s30, %s1780_s30 }
 0x254   :  { %v726_v60 = vmax.f32 %v692_v27, 0.0 }
 0x255   :  { %v888_v58 = vadd.f32 %v887_v56, %v852_v50  ;;  %v725_v53 = vmax.f32 %v687_v57, 0.0  ;;  %v875_v55 = vrot.slane %v874_v2, 1  ;;  %p1787_p7 = por %p1786_p6, %p1785_p5 }
 0x256   :  { %v855_v0 = vmul.f32 %v2118_v26, %v726_v60 }
 0x257   :  { %v854_v61 = vmul.f32 %v2115_v19, %v725_v53  ;;  %v889_v63 = vadd.f32 %v888_v58, %v853_v39  ;;  %v876_v10 = vadd.f32 %v875_v55, %v874_v2  ;;  %v925_v19 = vld [vmem:[#allocation9] sm:$0xff]  ;;  %p1788_p8 = pnand %p1787_p7, %p1781_p4 }
 0x258   :  { %v1654_v26 = vpack.c.bf16 %v926_v14, %v925_v19 }
 0x259   :  { %v890_v1 = vadd.f32 %v889_v63, %v854_v61 }
 0x25b   :  { %v891_v51 = vadd.f32 %v890_v1, %v855_v0 }
 0x25d   :  { %v892_v4 = vrot.slane %v891_v51, 4 }
 0x25f   :  { %v893_v5 = vadd.f32 %v892_v4, %v891_v51 }
 0x261   :  { %v894_v8 = vrot.slane %v893_v5, 2 }
 0x263   :  { %v895_v9 = vadd.f32 %v894_v8, %v893_v5 }
 0x265   :  { %v896_v7 = vrot.slane %v895_v9, 1 }
 0x267   :  { %v897_v11 = vadd.f32 %v896_v7, %v895_v9 }
 0x269   :  { %v901_v44 = vsel %vm900_vm1, %v897_v11, %v876_v10 }
 0x26a   :  { %v903_v12 = vadd.f32 %v901_v44, %v727_v52 }
 0x26c   :  { %904 = vst [vmem:[#allocation2] sm:$0x3] %v903_v12 }
 0x273   :  { %v908_v16 = vld [vmem:[#allocation2] sm:$0x3] }
 0x274   :  { %1496 = vmatmul.mubr.f32.vlgmr.msra.gmra.mrb[16].mxu1 %v908_v16 }
 0x275   :  { %1655 = vmatpush3.bf16.msra.mxu1 %v1654_v26  ;;  %1530 = vmatprep.mubr.msk.f32.mxu1 %vm1819_vm0, %v1818_v40  ;;  %v935_v40 = vld [vmem:[#allocation9 + $0x50] sm:$0xff] }
 0x276   :  { %1656 = vmatprep.subr.bf16.mxu1 %v1817_v28  ;;  %v1669_v31 = vpack.c.bf16 %v936_v30, %v935_v40 }
 0x279   :  { %1658 = vmatpush3.bf16.msra.mxu1 %v1657_v17 }
 0x27a   :  { %1659 = vmatprep.subr.bf16.mxu1 %v1817_v28 }
 0x27d   :  { %1661 = vmatpush3.bf16.msra.mxu1 %v1660_v59 }
 0x27e   :  { %1662 = vmatprep.subr.bf16.mxu1 %v1817_v28 }
 0x281   :  { %1664 = vmatpush3.bf16.msra.mxu1 %v1663_v24 }
 0x282   :  { %1665 = vmatprep.subr.bf16.mxu1 %v1817_v28 }
 0x285   :  { %1667 = vmatpush3.bf16.msra.mxu1 %v1666_v29 }
 0x286   :  { %1668 = vmatprep.subr.bf16.mxu1 %v1817_v28 }
 0x289   :  { %1670 = vmatpush3.bf16.msra.mxu1 %v1669_v31 }
 0x28a   :  { %1671 = vmatprep.subr.bf16.mxu1 %v1817_v28 }
 0x28d   :  { %1673 = vmatpush3.bf16.msra.mxu1 %v1672_v33 }
 0x28e   :  { %1674 = vmatprep.subr.bf16.mxu1 %v1817_v28 }
 0x291   :  { %1676 = vmatpush3.bf16.msra.mxu1 %v1675_v13 }
 0x347   :  { %v1014_v37 = vpop.f32.mrb[16].mxu1 }
 0x348   :  { %v1015_v38 = vadd.f32 %v1123_v36, %v1014_v37  ;;  %v1497_v41 = vpop.f32.mrb[17].mxu1 }
 0x34a   :  { %v1018_v42 = vmax.f32 %v1015_v38, 0.0 }
 0x34c   :  { %1531 = vmatmul.mubr.f32.vlgmr.msra.gmra.mrb[18].mxu1 %v1018_v42 }
 0x41f   :  { %v1092_v43 = vpop.f32.mrb[18].mxu1 }
 0x420   :  { %v1093_v45 = vadd.f32 %v1124_v23, %v1092_v43  ;;  %v1532_v28 = vpop.f32.mrb[19].mxu1 }
 0x422   :  { %v1096_v46 = vmul.f32 %v1093_v45, %v1093_v45 }
 0x424   :  { %v1098_v27 = vsel %vm1097_vm2, %v1096_v46, 0.0 }
 0x425   :  { %1099 = vadd.xlane.f32.xlu0 %v1098_v27 }
 0x4b2   :  { %v1100_v47 = vpop.xlane.xlu0 %1099 }
 0x4b3   :  { %v1101_v49 = vmax.f32 %v1100_v47, 1e-24 }
 0x4b5   :  { %1690 = vrsqrt.f32 %v1101_v49 }
 0x4bf   :  { %v1691_v50 = vpop.eup %1690 }
 0x4c0   :  { %v1103_v56 = vmul.f32 %v1691_v50, %v1093_v45 }
 0x4c2   :  { %1104 = vst [vmem:[#allocation11] sm:$0x3] %v1103_v56 }
 0x4c3   :  { %1791 = shalt.err (!%p1788_p8)
}
 0x4c4   :  { %s1792_s13 = scalar_lea.hbm %s2194_s9, 32 }
 0x4c5   :  { %p1793_p9 = scmp.ne.s32.totalorder %s2194_s9, %s1792_s13  ;;  %p1796_p10 = scmp.lt.u32.totalorder %s1792_s13, %s2194_s9 }
 0x4c7   :  { %p1798_p11 = pnand %p1796_p10, %p1793_p9 }
 0x4c9   :  { %1801 = shalt.err (!%p1798_p11)
}
 0x4ca   :  { %1114 = dma.vmem_to_hbm [thread:$0]  %s1112_s29, 32, %s2194_s9, [#allocation5]  }
 0x4cb   :  { %1808 = dma.done.wait [#allocation5], 32  }
 0x4cc   :  { %1809 = vsyncadd [#allocation5], 4294967264 }
 0x4cd   :  { %1118 = vsyncpa [#allocation4], 1 }
 0x4ce   :  { %1119 = vsyncpa [#allocation7], 1 }
 0x4cf   :  { %1120 = vsyncpa [#allocation10], 1 }
 0x4d0   :  { %1121 = vsyncpa [#allocation5], 1 }

</bundles_post_ra>
